<compile_context>
chip_gen: v5e
topology: v5e:2x2
jax: 0.10.0
libtpu: 0.0.40
codegen_flags: <defaults>
</compile_context>

<pallas_src>
import functools

import jax
import jax.numpy as jnp
from jax import lax
from jax.experimental import pallas as pl
from jax.experimental.pallas import tpu as pltpu


def _combo_kernel(*refs, gamma, n_pix, n_total_tiles, mask_tail, has_aux):
    if has_aux:
        logits_ref, aux_ref, tgt_ref, out_ref = refs
    else:
        logits_ref, tgt_ref, out_ref = refs
        aux_ref = None

    s = pl.program_id(1)          # core-split index
    j = pl.program_id(2)          # tile index within the split
    tiles_per_split = pl.num_programs(2)

    _, C, TR, L = logits_ref.shape
    G = TR // 8                   # row groups of 8 (wrapper guarantees TR % 8 == 0)

    # Output block (1, 1, 3+3C, 8, 128) is the accumulator: resident across j.
    @pl.when(j == 0)
    def _init():
        out_ref[...] = jnp.zeros_like(out_ref)

    def red2(x):                  # (TR, 128) -> (8, 128): cross-vreg adds only
        return jnp.sum(x.reshape(G, 8, L), axis=0)

    def red3(x):                  # (C, TR, 128) -> (C, 8, 128)
        return jnp.sum(x.reshape(C, G, 8, L), axis=1)

    def tile_body(masked):
        l = logits_ref[0].astype(jnp.float32)            # (C, TR, 128)
        t = tgt_ref[0]                                   # (TR, 128) int32

        if masked:
            # Only ever runs on the globally-last tile -> static pixel base.
            base = (n_total_tiles - 1) * TR * L
            row = lax.broadcasted_iota(jnp.int32, (TR, L), 0)
            lane = lax.broadcasted_iota(jnp.int32, (TR, L), 1)
            valid = (base + row * L + lane) < n_pix      # (TR, 128) bool
            l = jnp.where(valid[None], l, 0.0)           # keep padded logits finite

        # Softmax / log-softmax over the class axis (leading axis -> VALU chain).
        m = jnp.max(l, axis=0)                           # (TR, 128)
        e = jnp.exp(l - m[None])                         # (C, TR, 128)
        z = jnp.sum(e, axis=0)                           # (TR, 128)
        probs = e * pl.reciprocal(z, approx=True)[None]  # EUP rcp, frees VALU
        neg_logp = (m + jnp.log(z))[None] - l            # -log_softmax >= 0

        class_ids = lax.broadcasted_iota(jnp.int32, (C, TR, L), 0)
        oh = class_ids == t[None]
        if masked:
            oh = jnp.logical_and(oh, valid[None])
        one_hot = oh.astype(jnp.float32)                 # (C, TR, 128)

        logp_t = jnp.sum(one_hot * neg_logp, axis=0)     # per-pixel CE
        p_t = jnp.sum(one_hot * probs, axis=0)           # per-pixel p_target

        if float(gamma) == int(gamma) and gamma >= 0:
            focal_t = (1.0 - p_t) ** int(gamma) * logp_t  # integer_pow
        else:
            focal_t = (1.0 - p_t) ** gamma * logp_t

        # Accumulate tile-reduced slabs into the resident output block.
        out_ref[0, 0, 0] += red2(logp_t)                          # CE
        out_ref[0, 0, 1] += red2(focal_t)                         # focal
        out_ref[0, 0, 3:3 + C] += red3(one_hot * p_t[None])       # dice intersection
        if masked:
            validf = valid.astype(jnp.float32)
            out_ref[0, 0, 3 + C:3 + 2 * C] += red3(probs * validf[None])
        else:
            out_ref[0, 0, 3 + C:3 + 2 * C] += red3(probs)         # dice prob sum
        out_ref[0, 0, 3 + 2 * C:3 + 3 * C] += red3(one_hot)       # dice one-hot count

        if has_aux:
            la = aux_ref[0].astype(jnp.float32)
            if masked:
                la = jnp.where(valid[None], la, 0.0)
            ma = jnp.max(la, axis=0)
            ea = jnp.exp(la - ma[None])
            za = jnp.sum(ea, axis=0)
            neg_logp_a = (ma + jnp.log(za))[None] - la
            out_ref[0, 0, 2] += red2(jnp.sum(one_hot * neg_logp_a, axis=0))

    if not mask_tail:
        tile_body(masked=False)                 # fast path: no validity machinery
    elif n_total_tiles == 1:
        tile_body(masked=True)
    else:
        tile_idx = s * tiles_per_split + j      # only the last tile pays for masking

        @pl.when(tile_idx == n_total_tiles - 1)
        def _():
            tile_body(masked=True)

        @pl.when(tile_idx < n_total_tiles - 1)
        def _():
            tile_body(masked=False)


def _combo_pallas(logits, targets, aux_logits, *, gamma, smooth=1e-6,
                  block_rows=None):
    """Returns (ce, focal, dice, aux_ce) — each already mean-reduced."""
    N, C, H, W = logits.shape
    P = H * W
    # Rows of 128 lanes; row count rounded to a multiple of 8 so the in-kernel
    # (tr//8, 8, 128) partial reductions are layout-free reshapes.
    R = pl.cdiv(P, 128)
    R = ((R + 7) // 8) * 8
    Pp = R * 128

    def prep_logits(x):
        x = x.reshape(N, C, P)                  # keep HBM dtype; cast in-kernel
        if Pp != P:
            # TODO(synk): this pad rematerializes logits in HBM (one extra pass);
            # guarantee H*W % 1024 == 0 upstream to keep the kernel single-pass.
            x = jnp.pad(x, ((0, 0), (0, 0), (0, Pp - P)))
        return x.reshape(N, C, R, 128)

    l = prep_logits(logits)
    t = targets.reshape(N, P).astype(jnp.int32)
    if Pp != P:
        t = jnp.pad(t, ((0, 0), (0, Pp - P)), constant_values=-1)
    t = t.reshape(N, R, 128)

    # ~2 MiB of logits per block: after the accumulator shrink this keeps
    # double-buffered inputs (+aux,+targets) plus live elementwise temporaries
    # well under 48 MiB on v7x (64 MiB physical) and v5e/v6e (128 MiB).
    if block_rows is None:
        tr = max(8, ((2 << 20) // (C * 128 * 4)) // 8 * 8)
    else:
        tr = max(8, (block_rows // 8) * 8)
    tr = min(tr, R)
    assert tr % 8 == 0
    n_tiles = pl.cdiv(R, tr)
    mask_tail = (Pp != P) or (R % tr != 0)

    # 2-way pixel split so both TensorCores are used when the batch axis alone
    # cannot cover them (v7x megacore / v4-v5p). Harmless on single-core parts.
    split = 2 if (N == 1 and n_tiles >= 2 and n_tiles % 2 == 0) else 1
    tiles_per_split = n_tiles // split

    has_aux = aux_logits is not None
    K = 3 + 3 * C   # rows: ce, focal, aux | dice inter[C], p_sum[C], count[C]

    def pix_map(n, s, j):
        return (n, 0, s * tiles_per_split + j, 0)

    def tgt_map(n, s, j):
        return (n, s * tiles_per_split + j, 0)

    inputs = [l]
    in_specs = [pl.BlockSpec((1, C, tr, 128), pix_map)]
    if has_aux:
        inputs.append(prep_logits(aux_logits))
        in_specs.append(pl.BlockSpec((1, C, tr, 128), pix_map))
    inputs.append(t)
    in_specs.append(pl.BlockSpec((1, tr, 128), tgt_map))

    kernel = functools.partial(
        _combo_kernel, gamma=gamma, n_pix=P, n_total_tiles=n_tiles,
        mask_tail=mask_tail, has_aux=has_aux)

    out = pl.pallas_call(
        kernel,
        out_shape=jax.ShapeDtypeStruct((N, split, K, 8, 128), jnp.float32),
        grid_spec=pltpu.PrefetchScalarGridSpec(
            num_scalar_prefetch=0,
            grid=(N, split, tiles_per_split),
            in_specs=in_specs,
            out_specs=pl.BlockSpec((1, 1, K, 8, 128),
                                   lambda n, s, j: (n, s, 0, 0, 0)),
        ),
        compiler_params=pltpu.CompilerParams(
            dimension_semantics=("parallel", "parallel", "arbitrary"),
            vmem_limit_bytes=48 * 1024 * 1024,
        ),
    )(*inputs)

    # Tiny finalize in XLA: (N, split, K, 8, 128) ~ a few tens of KiB.
    n_pix_total = N * P
    ce = jnp.sum(out[:, :, 0]) / n_pix_total
    focal = jnp.sum(out[:, :, 1]) / n_pix_total
    aux_ce = jnp.sum(out[:, :, 2]) / n_pix_total
    inter = jnp.sum(out[:, :, 3:3 + C], axis=(1, 3, 4))            # (N, C)
    p_sum = jnp.sum(out[:, :, 3 + C:3 + 2 * C], axis=(1, 3, 4))
    cnt = jnp.sum(out[:, :, 3 + 2 * C:3 + 3 * C], axis=(1, 3, 4))
    dice = jnp.mean(1.0 - (2.0 * inter + smooth) / (p_sum + cnt + smooth))
    return ce, focal, dice, aux_ce


def combo_loss(logits, targets, aux_logits=None, *, num_classes,
               gamma=2.0, alpha=0.25, aux_weight=0.4, _block_rows=None):
    assert logits.shape[1] == num_classes
    ce, focal, dice, aux_ce = _combo_pallas(
        logits, targets, aux_logits, gamma=gamma, block_rows=_block_rows)
    total = ce + dice + alpha * focal
    if aux_logits is not None:
        total = total + aux_weight * aux_ce
    return total, ce


# Pure-JAX reference for a sanity check (mirrors the PyTorch forward).
def _ref_combo(logits, targets, aux_logits=None, *, num_classes,
               gamma=2.0, alpha=0.25, aux_weight=0.4):
    logp_all = jax.nn.log_softmax(logits, axis=1)
    one_hot = jax.nn.one_hot(targets, num_classes).transpose(0, 3, 1, 2)
    ce = -jnp.mean(jnp.sum(one_hot * logp_all, axis=1))
    neg_logp = -logp_all
    pt = jnp.exp(-neg_logp)
    focal = jnp.mean(jnp.sum(one_hot * ((1 - pt) ** gamma) * neg_logp, axis=1))
    probs = jax.nn.softmax(logits, axis=1)
    smooth = 1e-6
    inter = jnp.sum(probs * one_hot, axis=(2, 3))
    union = jnp.sum(probs, axis=(2, 3)) + jnp.sum(one_hot, axis=(2, 3))
    dice = jnp.mean(1 - (2.0 * inter + smooth) / (union + smooth))
    total = ce + dice + alpha * focal
    if aux_logits is not None:
        aux_logp = jax.nn.log_softmax(aux_logits, axis=1)
        aux_ce = -jnp.mean(jnp.sum(one_hot * aux_logp, axis=1))
        total = total + aux_weight * aux_ce
    return total, ce


def _check(name, got, ref, tol_total, tol_ce):
    gt, gc = got
    rt, rc = ref
    assert abs(float(gt) - float(rt)) < tol_total, (name, float(gt), float(rt))
    assert abs(float(gc) - float(rc)) < tol_ce, (name, float(gc), float(rc))


if __name__ == "__main__":
    key = jax.random.PRNGKey(0)
    k1, k2, k3, k4, k5, k6, k7, k8, k9 = jax.random.split(key, 9)

    # Tolerances: CE path uses exact logsumexp (tight); total also goes through
    # pl.reciprocal(approx=True) in softmax probs (dice/focal), so it is looser.
    TOL_TOTAL, TOL_CE = 5e-3, 5e-4

    # Test 1: small shapes (H*W needs padding -> masked last-tile path), with aux.
    N, C, H, W = 2, 4, 16, 16
    logits = jax.random.normal(k1, (N, C, H, W), dtype=jnp.float32)
    aux_logits = jax.random.normal(k2, (N, C, H, W), dtype=jnp.float32)
    targets = jax.random.randint(k3, (N, H, W), 0, C, dtype=jnp.int32)

    got = combo_loss(logits, targets, aux_logits, num_classes=C)
    jax.block_until_ready(got)
    _check("aux", got, _ref_combo(logits, targets, aux_logits, num_classes=C),
           TOL_TOTAL, TOL_CE)

    got_na = combo_loss(logits, targets, None, num_classes=C)
    jax.block_until_ready(got_na)
    _check("no_aux", got_na, _ref_combo(logits, targets, None, num_classes=C),
           TOL_TOTAL, TOL_CE)

    # Test 2: H*W multiple of 1024 -> mask-free fast path.
    H2 = W2 = 32
    l2 = jax.random.normal(k4, (2, C, H2, W2), dtype=jnp.float32)
    a2 = jax.random.normal(k5, (2, C, H2, W2), dtype=jnp.float32)
    t2 = jax.random.randint(k6, (2, H2, W2), 0, C, dtype=jnp.int32)
    got2 = combo_loss(l2, t2, a2, num_classes=C)
    jax.block_until_ready(got2)
    _check("fast", got2, _ref_combo(l2, t2, a2, num_classes=C), TOL_TOTAL, TOL_CE)

    # Test 3: N=1 with multiple tiles -> 2-way core split + masked last tile
    # (block_rows forced small so the multi-tile / split path is exercised).
    H3, W3 = 60, 64
    l3 = jax.random.normal(k7, (1, C, H3, W3), dtype=jnp.float32)
    a3 = jax.random.normal(k8, (1, C, H3, W3), dtype=jnp.float32)
    t3 = jax.random.randint(k9, (1, H3, W3), 0, C, dtype=jnp.int32)
    got3 = combo_loss(l3, t3, a3, num_classes=C, _block_rows=8)
    jax.block_until_ready(got3)
    _check("split", got3, _ref_combo(l3, t3, a3, num_classes=C), TOL_TOTAL, TOL_CE)

    print("KERNEL_OK")
</pallas_src>

<mosaic_0001>
module attributes {stable_mosaic.version = 11 : i64} {
  func.func @_combo_kernel(%arg0: i32, %arg1: i32, %arg2: i32, %arg3: memref<1x4x8x128xf32, #tpu.memory_space<vmem>>, %arg4: memref<1x4x8x128xf32, #tpu.memory_space<vmem>>, %arg5: memref<1x8x128xi32, #tpu.memory_space<vmem>>, %arg6: memref<1x1x15x8x128xf32, #tpu.memory_space<vmem>>) attributes {dimension_semantics = [#tpu.dimension_semantics<parallel>, #tpu.dimension_semantics<parallel>, #tpu.dimension_semantics<arbitrary>], iteration_bounds = array<i64: 2, 1, 1>, scalar_prefetch = 0 : i64, scratch_operands = 0 : i64, tpu.core_type = #tpu.core_type<tc>, window_params = [{transform_indices = @transform_0, window_bounds = array<i64: 1, 4, 8, 128>}, {transform_indices = @transform_1, window_bounds = array<i64: 1, 4, 8, 128>}, {transform_indices = @transform_2, window_bounds = array<i64: 1, 8, 128>}, {transform_indices = @transform_3, window_bounds = array<i64: 1, 1, 15, 8, 128>}]} {
    %c0_i32 = arith.constant 0 : i32
    %0 = arith.cmpi eq, %arg2, %c0_i32 : i32
    %1 = arith.extui %0 : i1 to i32
    %c0_i32_0 = arith.constant 0 : i32
    %2 = arith.cmpi ne, %1, %c0_i32_0 : i32
    scf.if %2 {
      %cst_82 = arith.constant 0.000000e+00 : f32
      %129 = vector.broadcast %cst_82 : f32 to vector<1x1x15x8x128xf32>
      %c0_83 = arith.constant 0 : index
      %c0_84 = arith.constant 0 : index
      %c0_85 = arith.constant 0 : index
      %c0_86 = arith.constant 0 : index
      %c0_87 = arith.constant 0 : index
      %130 = vector.load %arg6[%c0_83, %c0_84, %c0_85, %c0_86, %c0_87] : memref<1x1x15x8x128xf32, #tpu.memory_space<vmem>>, vector<1x1x15x8x128xf32>
      tpu.vector_store %arg6[%c0_83, %c0_84, %c0_85, %c0_86, %c0_87], %129 {strides = array<i32>} : memref<1x1x15x8x128xf32, #tpu.memory_space<vmem>>, vector<1x1x15x8x128xf32>,
    } else {
    }
    %c0 = arith.constant 0 : index
    %c0_1 = arith.constant 0 : index
    %c0_2 = arith.constant 0 : index
    %c0_3 = arith.constant 0 : index
    %3 = vector.load %arg3[%c0, %c0_1, %c0_2, %c0_3] : memref<1x4x8x128xf32, #tpu.memory_space<vmem>>, vector<1x4x8x128xf32>
    %4 = vector.shape_cast %3 : vector<1x4x8x128xf32> to vector<4x8x128xf32>
    %c0_4 = arith.constant 0 : index
    %c0_5 = arith.constant 0 : index
    %c0_6 = arith.constant 0 : index
    %5 = vector.load %arg5[%c0_4, %c0_5, %c0_6] : memref<1x8x128xi32, #tpu.memory_space<vmem>>, vector<1x8x128xi32>
    %6 = vector.shape_cast %5 : vector<1x8x128xi32> to vector<8x128xi32>
    %7 = tpu.iota {dimensions = array<i32: 0>} : vector<8x128xi32>
    %8 = tpu.iota {dimensions = array<i32: 1>} : vector<8x128xi32>
    %c128_i32 = arith.constant 128 : i32
    %9 = vector.broadcast %c128_i32 : i32 to vector<8x128xi32>
    %10 = arith.muli %7, %9 : vector<8x128xi32>
    %c0_i32_7 = arith.constant 0 : i32
    %11 = vector.broadcast %c0_i32_7 : i32 to vector<8x128xi32>
    %12 = arith.addi %11, %10 : vector<8x128xi32>
    %13 = arith.addi %12, %8 : vector<8x128xi32>
    %c256_i32 = arith.constant 256 : i32
    %14 = vector.broadcast %c256_i32 : i32 to vector<8x128xi32>
    %15 = arith.cmpi slt, %13, %14 : vector<8x128xi32>
    %16 = vector.shape_cast %15 : vector<8x128xi1> to vector<1x8x128xi1>
    %cst = arith.constant 0.000000e+00 : f32
    %17 = vector.shape_cast %16 : vector<1x8x128xi1> to vector<1x8x128xi1>
    %18 = vector.broadcast %17 : vector<1x8x128xi1> to vector<4x8x128xi1>
    %19 = vector.broadcast %cst : f32 to vector<4x8x128xf32>
    %20 = arith.select %18, %4, %19 : vector<4x8x128xi1>, vector<4x8x128xf32>
    %cst_8 = arith.constant dense<0xFF800000> : vector<8x128xf32>
    %21 = vector.multi_reduction <maximumf>, %20, %cst_8 [0] : vector<4x8x128xf32> to vector<8x128xf32>
    %22 = vector.shape_cast %21 : vector<8x128xf32> to vector<1x8x128xf32>
    %23 = vector.broadcast %22 : vector<1x8x128xf32> to vector<4x8x128xf32>
    %24 = arith.subf %20, %23 : vector<4x8x128xf32>
    %25 = math.exp %24 : vector<4x8x128xf32>
    %cst_9 = arith.constant dense<0.000000e+00> : vector<8x128xf32>
    %26 = vector.multi_reduction <add>, %25, %cst_9 [0] : vector<4x8x128xf32> to vector<8x128xf32>
    %27 = tpu.reciprocal %26 {approx = true} : vector<8x128xf32> -> vector<8x128xf32>
    %28 = vector.shape_cast %27 : vector<8x128xf32> to vector<1x8x128xf32>
    %29 = vector.broadcast %28 : vector<1x8x128xf32> to vector<4x8x128xf32>
    %30 = arith.mulf %25, %29 : vector<4x8x128xf32>
    %31 = math.log %26 : vector<8x128xf32>
    %32 = arith.addf %21, %31 : vector<8x128xf32>
    %33 = vector.shape_cast %32 : vector<8x128xf32> to vector<1x8x128xf32>
    %34 = vector.broadcast %33 : vector<1x8x128xf32> to vector<4x8x128xf32>
    %35 = arith.subf %34, %20 : vector<4x8x128xf32>
    %36 = tpu.iota {dimensions = array<i32: 0>} : vector<4x8x128xi32>
    %37 = vector.shape_cast %6 : vector<8x128xi32> to vector<1x8x128xi32>
    %38 = vector.broadcast %37 : vector<1x8x128xi32> to vector<4x8x128xi32>
    %39 = arith.cmpi eq, %36, %38 : vector<4x8x128xi32>
    %40 = vector.shape_cast %15 : vector<8x128xi1> to vector<1x8x128xi1>
    %41 = vector.broadcast %40 : vector<1x8x128xi1> to vector<4x8x128xi1>
    %42 = arith.andi %39, %41 : vector<4x8x128xi1>
    %43 = arith.extui %42 : vector<4x8x128xi1> to vector<4x8x128xi32>
    %44 = arith.sitofp %43 : vector<4x8x128xi32> to vector<4x8x128xf32>
    %45 = arith.mulf %44, %35 : vector<4x8x128xf32>
    %cst_10 = arith.constant dense<0.000000e+00> : vector<8x128xf32>
    %46 = vector.multi_reduction <add>, %45, %cst_10 [0] : vector<4x8x128xf32> to vector<8x128xf32>
    %47 = arith.mulf %44, %30 : vector<4x8x128xf32>
    %cst_11 = arith.constant dense<0.000000e+00> : vector<8x128xf32>
    %48 = vector.multi_reduction <add>, %47, %cst_11 [0] : vector<4x8x128xf32> to vector<8x128xf32>
    %cst_12 = arith.constant 1.000000e+00 : f32
    %49 = vector.broadcast %cst_12 : f32 to vector<8x128xf32>
    %50 = arith.subf %49, %48 : vector<8x128xf32>
    %51 = arith.mulf %50, %50 : vector<8x128xf32>
    %52 = arith.mulf %51, %46 : vector<8x128xf32>
    %c0_13 = arith.constant 0 : index
    %c0_14 = arith.constant 0 : index
    %c0_15 = arith.constant 0 : index
    %c0_16 = arith.constant 0 : index
    %c0_17 = arith.constant 0 : index
    %53 = vector.load %arg6[%c0_13, %c0_14, %c0_15, %c0_16, %c0_17] : memref<1x1x15x8x128xf32, #tpu.memory_space<vmem>>, vector<1x1x1x8x128xf32>
    %54 = vector.shape_cast %53 : vector<1x1x1x8x128xf32> to vector<8x128xf32>
    %55 = vector.shape_cast %46 : vector<8x128xf32> to vector<1x8x128xf32>
    %cst_18 = arith.constant dense<0.000000e+00> : vector<8x128xf32>
    %56 = vector.multi_reduction <add>, %55, %cst_18 [0] : vector<1x8x128xf32> to vector<8x128xf32>
    %57 = arith.addf %54, %56 : vector<8x128xf32>
    %c0_19 = arith.constant 0 : index
    %c0_20 = arith.constant 0 : index
    %c0_21 = arith.constant 0 : index
    %c0_22 = arith.constant 0 : index
    %c0_23 = arith.constant 0 : index
    %58 = vector.load %arg6[%c0_19, %c0_20, %c0_21, %c0_22, %c0_23] : memref<1x1x15x8x128xf32, #tpu.memory_space<vmem>>, vector<1x1x1x8x128xf32>
    %59 = vector.shape_cast %58 : vector<1x1x1x8x128xf32> to vector<8x128xf32>
    %60 = vector.shape_cast %57 : vector<8x128xf32> to vector<1x1x1x8x128xf32>
    tpu.vector_store %arg6[%c0_19, %c0_20, %c0_21, %c0_22, %c0_23], %60 {strides = array<i32>} : memref<1x1x15x8x128xf32, #tpu.memory_space<vmem>>, vector<1x1x1x8x128xf32>,
    %c0_24 = arith.constant 0 : index
    %c0_25 = arith.constant 0 : index
    %c1 = arith.constant 1 : index
    %c0_26 = arith.constant 0 : index
    %c0_27 = arith.constant 0 : index
    %61 = vector.load %arg6[%c0_24, %c0_25, %c1, %c0_26, %c0_27] : memref<1x1x15x8x128xf32, #tpu.memory_space<vmem>>, vector<1x1x1x8x128xf32>
    %62 = vector.shape_cast %61 : vector<1x1x1x8x128xf32> to vector<8x128xf32>
    %63 = vector.shape_cast %52 : vector<8x128xf32> to vector<1x8x128xf32>
    %cst_28 = arith.constant dense<0.000000e+00> : vector<8x128xf32>
    %64 = vector.multi_reduction <add>, %63, %cst_28 [0] : vector<1x8x128xf32> to vector<8x128xf32>
    %65 = arith.addf %62, %64 : vector<8x128xf32>
    %c0_29 = arith.constant 0 : index
    %c0_30 = arith.constant 0 : index
    %c1_31 = arith.constant 1 : index
    %c0_32 = arith.constant 0 : index
    %c0_33 = arith.constant 0 : index
    %66 = vector.load %arg6[%c0_29, %c0_30, %c1_31, %c0_32, %c0_33] : memref<1x1x15x8x128xf32, #tpu.memory_space<vmem>>, vector<1x1x1x8x128xf32>
    %67 = vector.shape_cast %66 : vector<1x1x1x8x128xf32> to vector<8x128xf32>
    %68 = vector.shape_cast %65 : vector<8x128xf32> to vector<1x1x1x8x128xf32>
    tpu.vector_store %arg6[%c0_29, %c0_30, %c1_31, %c0_32, %c0_33], %68 {strides = array<i32>} : memref<1x1x15x8x128xf32, #tpu.memory_space<vmem>>, vector<1x1x1x8x128xf32>,
    %c0_34 = arith.constant 0 : index
    %c0_35 = arith.constant 0 : index
    %c3 = arith.constant 3 : index
    %c0_36 = arith.constant 0 : index
    %c0_37 = arith.constant 0 : index
    %69 = vector.load %arg6[%c0_34, %c0_35, %c3, %c0_36, %c0_37] : memref<1x1x15x8x128xf32, #tpu.memory_space<vmem>>, vector<1x1x4x8x128xf32>
    %70 = vector.shape_cast %69 : vector<1x1x4x8x128xf32> to vector<4x8x128xf32>
    %71 = vector.shape_cast %48 : vector<8x128xf32> to vector<1x8x128xf32>
    %72 = vector.broadcast %71 : vector<1x8x128xf32> to vector<4x8x128xf32>
    %73 = arith.mulf %44, %72 : vector<4x8x128xf32>
    %74 = vector.shape_cast %73 : vector<4x8x128xf32> to vector<4x1x8x128xf32>
    %cst_38 = arith.constant dense<0.000000e+00> : vector<4x8x128xf32>
    %75 = vector.multi_reduction <add>, %74, %cst_38 [1] : vector<4x1x8x128xf32> to vector<4x8x128xf32>
    %76 = arith.addf %70, %75 : vector<4x8x128xf32>
    %c0_39 = arith.constant 0 : index
    %c0_40 = arith.constant 0 : index
    %c3_41 = arith.constant 3 : index
    %c0_42 = arith.constant 0 : index
    %c0_43 = arith.constant 0 : index
    %77 = vector.load %arg6[%c0_39, %c0_40, %c3_41, %c0_42, %c0_43] : memref<1x1x15x8x128xf32, #tpu.memory_space<vmem>>, vector<1x1x4x8x128xf32>
    %78 = vector.shape_cast %77 : vector<1x1x4x8x128xf32> to vector<4x8x128xf32>
    %79 = vector.shape_cast %76 : vector<4x8x128xf32> to vector<1x1x4x8x128xf32>
    tpu.vector_store %arg6[%c0_39, %c0_40, %c3_41, %c0_42, %c0_43], %79 {strides = array<i32>} : memref<1x1x15x8x128xf32, #tpu.memory_space<vmem>>, vector<1x1x4x8x128xf32>,
    %80 = arith.extui %15 : vector<8x128xi1> to vector<8x128xi32>
    %81 = arith.sitofp %80 : vector<8x128xi32> to vector<8x128xf32>
    %c0_44 = arith.constant 0 : index
    %c0_45 = arith.constant 0 : index
    %c7 = arith.constant 7 : index
    %c0_46 = arith.constant 0 : index
    %c0_47 = arith.constant 0 : index
    %82 = vector.load %arg6[%c0_44, %c0_45, %c7, %c0_46, %c0_47] : memref<1x1x15x8x128xf32, #tpu.memory_space<vmem>>, vector<1x1x4x8x128xf32>
    %83 = vector.shape_cast %82 : vector<1x1x4x8x128xf32> to vector<4x8x128xf32>
    %84 = vector.shape_cast %81 : vector<8x128xf32> to vector<1x8x128xf32>
    %85 = vector.broadcast %84 : vector<1x8x128xf32> to vector<4x8x128xf32>
    %86 = arith.mulf %30, %85 : vector<4x8x128xf32>
    %87 = vector.shape_cast %86 : vector<4x8x128xf32> to vector<4x1x8x128xf32>
    %cst_48 = arith.constant dense<0.000000e+00> : vector<4x8x128xf32>
    %88 = vector.multi_reduction <add>, %87, %cst_48 [1] : vector<4x1x8x128xf32> to vector<4x8x128xf32>
    %89 = arith.addf %83, %88 : vector<4x8x128xf32>
    %c0_49 = arith.constant 0 : index
    %c0_50 = arith.constant 0 : index
    %c7_51 = arith.constant 7 : index
    %c0_52 = arith.constant 0 : index
    %c0_53 = arith.constant 0 : index
    %90 = vector.load %arg6[%c0_49, %c0_50, %c7_51, %c0_52, %c0_53] : memref<1x1x15x8x128xf32, #tpu.memory_space<vmem>>, vector<1x1x4x8x128xf32>
    %91 = vector.shape_cast %90 : vector<1x1x4x8x128xf32> to vector<4x8x128xf32>
    %92 = vector.shape_cast %89 : vector<4x8x128xf32> to vector<1x1x4x8x128xf32>
    tpu.vector_store %arg6[%c0_49, %c0_50, %c7_51, %c0_52, %c0_53], %92 {strides = array<i32>} : memref<1x1x15x8x128xf32, #tpu.memory_space<vmem>>, vector<1x1x4x8x128xf32>,
    %c0_54 = arith.constant 0 : index
    %c0_55 = arith.constant 0 : index
    %c11 = arith.constant 11 : index
    %c0_56 = arith.constant 0 : index
    %c0_57 = arith.constant 0 : index
    %93 = vector.load %arg6[%c0_54, %c0_55, %c11, %c0_56, %c0_57] : memref<1x1x15x8x128xf32, #tpu.memory_space<vmem>>, vector<1x1x4x8x128xf32>
    %94 = vector.shape_cast %93 : vector<1x1x4x8x128xf32> to vector<4x8x128xf32>
    %95 = vector.shape_cast %44 : vector<4x8x128xf32> to vector<4x1x8x128xf32>
    %cst_58 = arith.constant dense<0.000000e+00> : vector<4x8x128xf32>
    %96 = vector.multi_reduction <add>, %95, %cst_58 [1] : vector<4x1x8x128xf32> to vector<4x8x128xf32>
    %97 = arith.addf %94, %96 : vector<4x8x128xf32>
    %c0_59 = arith.constant 0 : index
    %c0_60 = arith.constant 0 : index
    %c11_61 = arith.constant 11 : index
    %c0_62 = arith.constant 0 : index
    %c0_63 = arith.constant 0 : index
    %98 = vector.load %arg6[%c0_59, %c0_60, %c11_61, %c0_62, %c0_63] : memref<1x1x15x8x128xf32, #tpu.memory_space<vmem>>, vector<1x1x4x8x128xf32>
    %99 = vector.shape_cast %98 : vector<1x1x4x8x128xf32> to vector<4x8x128xf32>
    %100 = vector.shape_cast %97 : vector<4x8x128xf32> to vector<1x1x4x8x128xf32>
    tpu.vector_store %arg6[%c0_59, %c0_60, %c11_61, %c0_62, %c0_63], %100 {strides = array<i32>} : memref<1x1x15x8x128xf32, #tpu.memory_space<vmem>>, vector<1x1x4x8x128xf32>,
    %c0_64 = arith.constant 0 : index
    %c0_65 = arith.constant 0 : index
    %c0_66 = arith.constant 0 : index
    %c0_67 = arith.constant 0 : index
    %101 = vector.load %arg4[%c0_64, %c0_65, %c0_66, %c0_67] : memref<1x4x8x128xf32, #tpu.memory_space<vmem>>, vector<1x4x8x128xf32>
    %102 = vector.shape_cast %101 : vector<1x4x8x128xf32> to vector<4x8x128xf32>
    %103 = vector.shape_cast %15 : vector<8x128xi1> to vector<1x8x128xi1>
    %cst_68 = arith.constant 0.000000e+00 : f32
    %104 = vector.shape_cast %103 : vector<1x8x128xi1> to vector<1x8x128xi1>
    %105 = vector.broadcast %104 : vector<1x8x128xi1> to vector<4x8x128xi1>
    %106 = vector.broadcast %cst_68 : f32 to vector<4x8x128xf32>
    %107 = arith.select %105, %102, %106 : vector<4x8x128xi1>, vector<4x8x128xf32>
    %cst_69 = arith.constant dense<0xFF800000> : vector<8x128xf32>
    %108 = vector.multi_reduction <maximumf>, %107, %cst_69 [0] : vector<4x8x128xf32> to vector<8x128xf32>
    %109 = vector.shape_cast %108 : vector<8x128xf32> to vector<1x8x128xf32>
    %110 = vector.broadcast %109 : vector<1x8x128xf32> to vector<4x8x128xf32>
    %111 = arith.subf %107, %110 : vector<4x8x128xf32>
    %112 = math.exp %111 : vector<4x8x128xf32>
    %cst_70 = arith.constant dense<0.000000e+00> : vector<8x128xf32>
    %113 = vector.multi_reduction <add>, %112, %cst_70 [0] : vector<4x8x128xf32> to vector<8x128xf32>
    %114 = math.log %113 : vector<8x128xf32>
    %115 = arith.addf %108, %114 : vector<8x128xf32>
    %116 = vector.shape_cast %115 : vector<8x128xf32> to vector<1x8x128xf32>
    %117 = vector.broadcast %116 : vector<1x8x128xf32> to vector<4x8x128xf32>
    %118 = arith.subf %117, %107 : vector<4x8x128xf32>
    %c0_71 = arith.constant 0 : index
    %c0_72 = arith.constant 0 : index
    %c2 = arith.constant 2 : index
    %c0_73 = arith.constant 0 : index
    %c0_74 = arith.constant 0 : index
    %119 = vector.load %arg6[%c0_71, %c0_72, %c2, %c0_73, %c0_74] : memref<1x1x15x8x128xf32, #tpu.memory_space<vmem>>, vector<1x1x1x8x128xf32>
    %120 = vector.shape_cast %119 : vector<1x1x1x8x128xf32> to vector<8x128xf32>
    %121 = arith.mulf %44, %118 : vector<4x8x128xf32>
    %cst_75 = arith.constant dense<0.000000e+00> : vector<8x128xf32>
    %122 = vector.multi_reduction <add>, %121, %cst_75 [0] : vector<4x8x128xf32> to vector<8x128xf32>
    %123 = vector.shape_cast %122 : vector<8x128xf32> to vector<1x8x128xf32>
    %cst_76 = arith.constant dense<0.000000e+00> : vector<8x128xf32>
    %124 = vector.multi_reduction <add>, %123, %cst_76 [0] : vector<1x8x128xf32> to vector<8x128xf32>
    %125 = arith.addf %120, %124 : vector<8x128xf32>
    %c0_77 = arith.constant 0 : index
    %c0_78 = arith.constant 0 : index
    %c2_79 = arith.constant 2 : index
    %c0_80 = arith.constant 0 : index
    %c0_81 = arith.constant 0 : index
    %126 = vector.load %arg6[%c0_77, %c0_78, %c2_79, %c0_80, %c0_81] : memref<1x1x15x8x128xf32, #tpu.memory_space<vmem>>, vector<1x1x1x8x128xf32>
    %127 = vector.shape_cast %126 : vector<1x1x1x8x128xf32> to vector<8x128xf32>
    %128 = vector.shape_cast %125 : vector<8x128xf32> to vector<1x1x1x8x128xf32>
    tpu.vector_store %arg6[%c0_77, %c0_78, %c2_79, %c0_80, %c0_81], %128 {strides = array<i32>} : memref<1x1x15x8x128xf32, #tpu.memory_space<vmem>>, vector<1x1x1x8x128xf32>,
    return
  }
  func.func @transform_0(%arg0: i32, %arg1: i32, %arg2: i32) -> (i32, i32, i32, i32) {
    %c1_i32 = arith.constant 1 : i32
    %0 = arith.muli %arg1, %c1_i32 : i32
    %1 = arith.addi %0, %arg2 : i32
    %c0_i32 = arith.constant 0 : i32
    %c0_i32_0 = arith.constant 0 : i32
    %c0_i32_1 = arith.constant 0 : i32
    return %arg0, %c0_i32, %1, %c0_i32_0 : i32, i32, i32, i32
  }
  func.func @transform_1(%arg0: i32, %arg1: i32, %arg2: i32) -> (i32, i32, i32, i32) {
    %c1_i32 = arith.constant 1 : i32
    %0 = arith.muli %arg1, %c1_i32 : i32
    %1 = arith.addi %0, %arg2 : i32
    %c0_i32 = arith.constant 0 : i32
    %c0_i32_0 = arith.constant 0 : i32
    %c0_i32_1 = arith.constant 0 : i32
    return %arg0, %c0_i32, %1, %c0_i32_0 : i32, i32, i32, i32
  }
  func.func @transform_2(%arg0: i32, %arg1: i32, %arg2: i32) -> (i32, i32, i32) {
    %c1_i32 = arith.constant 1 : i32
    %0 = arith.muli %arg1, %c1_i32 : i32
    %1 = arith.addi %0, %arg2 : i32
    %c0_i32 = arith.constant 0 : i32
    %c0_i32_0 = arith.constant 0 : i32
    return %arg0, %1, %c0_i32 : i32, i32, i32
  }
  func.func @transform_3(%arg0: i32, %arg1: i32, %arg2: i32) -> (i32, i32, i32, i32, i32) {
    %c0_i32 = arith.constant 0 : i32
    %c0_i32_0 = arith.constant 0 : i32
    %c0_i32_1 = arith.constant 0 : i32
    %c0_i32_2 = arith.constant 0 : i32
    return %arg0, %arg1, %c0_i32, %c0_i32_0, %c0_i32_1 : i32, i32, i32, i32, i32
  }
}

</mosaic_0001>

<bundles_post_ra>
// kernel: tpu_custom_call.1
= control target key start
LH: loop header
LB: loop body
LE: loop exit
PB: predicated region body
PF: predicated region fallthrough
CT: control target
= control target key end

     0   :  { %s1330_s0 = inlined_call_operand.hbm [shape: f32[2,4,8,128], index: 0, kind: input, shape index: {}]   ;;  %s1331_s1 = inlined_call_operand.hbm [shape: f32[2,4,8,128], index: 1, kind: input, shape index: {}]   ;;  %s1332_s2 = inlined_call_operand.hbm [shape: s32[2,8,128], index: 2, kind: input, shape index: {}]   ;;  %s1333_s3 = inlined_call_operand.hbm [shape: f32[2,1,15,8,128], index: 3, kind: output, shape index: {}]  }
   0x1   :  { %1342 = sst [smem:[#allocation19_spill]] %s1331_s1 }
   0x2   :  { %8 = vsyncpa [#allocation3], 0 }
   0x3   :  { %10 = vsyncpa [#allocation3 + $0x1], 0 }
   0x4   :  { %11 = vsyncpa [#allocation6], 0 }
   0x5   :  { %13 = vsyncpa [#allocation6 + $0x1], 0 }
   0x6   :  { %14 = vsyncpa [#allocation4], 0 }
   0x7   :  { %16 = vsyncpa [#allocation4 + $0x1], 0  ;;  %s1039_s12 = smov 0   ;;  %s1041_s13 = smov 0  }
   0x8   :  { %s1043_s14 = smov 0   ;;  %s1045_s15 = smov 0  }
   0x9   :  { %s1047_s16 = smov 0   ;;  %s1049_s17 = smov 0  }
   0xa LB: > { %1343 = sst [smem:[#allocation12_spill]] %s992_s12  ;;  %s1070_s18 = sadd.s32 4294967295, %s1012_s17   ;;  %s1012_s17 = sphi %s1049_s17, %s22_s17   ;;  %s1008_s16 = sphi %s1047_s16, %s1367_s16   ;;  %s1004_s15 = sphi %s1045_s15, %s1366_s15   ;;  %s1000_s14 = sphi %s1043_s14, %s1362_s14   ;;  %s996_s13 = sphi %s1041_s13, %s1365_s13   ;;  %s992_s12 = sphi %s1039_s12, %s1364_s12  }
   0xb   : > { %1344 = sst [smem:[#allocation13_spill]] %s1000_s14  ;;  %s682_s19 = sadd.s32 4294967294, %s1012_s17  }
   0xc   : > { %1345 = sst [smem:[#allocation14_spill]] %s1012_s17  ;;  %s41_s20 = sadd.s32 1, %s1008_s16 }
   0xd   : > { %s52_s21 = sadd.s32 1, %s1000_s14  ;;  %p43_p0 = scmp.ge.s32.totalorder %s41_s20, 2 }
   0xe   : > { %p59_p1 = scmp.ne.s32.totalorder %s1000_s14, %s996_s13  ;;  %p60_p2 = scmp.eq.s32.totalorder %s1012_s17, 0 }
   0xf   : > { %p65_p3 = scmp.ne.s32.totalorder %s996_s13, %s992_s12  ;;  %s1369_s20 = smov (%p43_p0, %s41_s20), 0 }
  0x10   : > { %1346 = sst [smem:[#allocation15_spill]] %s1369_s20  ;;  %p1082_p4 = por %p60_p2, %p59_p1 }
  0x11   : > { %p66_p5 = scmp.eq.s32.totalorder %s1070_s18, 0  ;;  %s47_s23 = ssub.s32 %s1008_s16, %s1369_s20 }
  0x12   : > { %p151_p6 = scmp.eq.s32.totalorder %s1070_s18, 1  ;;  %p50_p7 = scmp.eq.s32.totalorder %s47_s23, 0 }
  0x13   : > { %p1090_p8 = por %p66_p5, %p65_p3  ;;  %p157_p10 = scmp.eq.s32.totalorder %s682_s19, 1 }
  0x14   : > { %p1094_p9 = por %p151_p6, %p59_p1  ;;  %p684_p12 = scmp.ge.s32.totalorder %s1012_s17, 2 }
  0x15   : > { %s1099_s26 = scalar_select %p50_p7, %s1000_s14, %s52_s21  }
  0x16   : > { %s1349_s25 = scalar_select %p1094_p9, 1, 0 }
  0x17   : > { %1351 = sst [smem:[#allocation17_spill]] %s1099_s26  ;;  %p1101_p11 = por %p157_p10, %p65_p3 }
  0x18   : > { %1350 = sst [smem:[#allocation16_spill]] %s1349_s25  ;;  %p759_p13 = scmp.lt.s32.totalorder %s1012_s17, 2 }
  0x19   : > { %s1352_s27 = scalar_select %p1101_p11, 1, 0 }
  0x1a   : > { %s1108_s28 = sand.u32 1, %s1000_s14   ;;  %s733_s30 = sshll.u32 %s1008_s16, 5 }
  0x1b   : > { %1353 = sst [smem:[#allocation18_spill]] %s1352_s27  ;;  %s685_s29 = sshll.u32 %s1108_s28, 5 }
  0x1c   : > { %p1114_p0 = pnand %p759_p13, %p1082_p4  ;;  %s201_s5 = sand.u32 1, %s1012_s17  }
  0x1d   : > { %s1355_s1 = sld [smem:[#allocation19_spill]]  ;;  %s205_s10 = scalar_lea.vmem [#allocation5], %s685_s29 }
  0x1e   : > { %s215_s11 = sshll.u32 %s205_s10, 4  ;;  %s202_s19 = scalar_lea.sflag [#allocation6], %s201_s5  ;;  %s216_s11 = int_to_ptr.vmem [resolvable:$true] %s215_s11 }
  0x1f   : > { %s1014_s21 = smov 128   ;;  %s1015_s22 = smov 8  }
  0x20   : > { %p693_p1 = scmp.ge.s32.totalorder %s1012_s17, 1  ;;  %p244_p2 = scmp.lt.s32.totalorder %s1012_s17, 3 }
  0x21   : > { %s178_s5 = scalar_lea.sflag [#allocation3], %s1108_s28 }
  0x22   : > { %p1126_p3 = pnand %p693_p1, %p244_p2 }
  0x23   : > { %s212_s8 = scalar_lea.hbm %s1355_s1, %s733_s30  ;;  %s181_s1 = scalar_lea.vmem [#allocation2], %s685_s29 }
  0x24   : > { %s213_s9 = sshll.u32 %s212_s8, 4  ;;  %s188_s8 = scalar_lea.hbm %s1330_s0, %s733_s30  ;;  %s214_s9 = int_to_ptr.hbm [resolvable:$true] %s213_s9 }
  0x25   : > { %751 = dma.hbm_to_vmem [thread:$0]  (!%p1114_p0), %s214_s9, 512, %s216_s11, %s202_s19, %s1014_s21, %s1014_s21, %s1015_s22  }
  0x26   : > { %s189_s10 = sshll.u32 %s188_s8, 4  ;;  %s191_s20 = sshll.u32 %s181_s1, 4  ;;  %s190_s10 = int_to_ptr.hbm [resolvable:$true] %s189_s10  ;;  %s192_s20 = int_to_ptr.vmem [resolvable:$true] %s191_s20 }
  0x27   : > { %748 = dma.hbm_to_vmem [thread:$0]  (!%p1114_p0), %s190_s10, 512, %s192_s20, %s178_s5, %s1014_s21, %s1014_s21, %s1015_s22  }
  0x28   : > { %s691_s9 = sshll.u32 %s1108_s28, 3  ;;  %s692_s11 = sshll.u32 %s1008_s16, 3 }
  0x29   : > { %s235_s17 = scalar_lea.hbm %s1332_s2, %s692_s11  ;;  %s229_s12 = scalar_lea.vmem [#allocation7], %s691_s9 }
  0x2a   : > { %s237_s27 = sshll.u32 %s235_s17, 4  ;;  %s239_s25 = sshll.u32 %s229_s12, 4  ;;  %s238_s27 = int_to_ptr.hbm [resolvable:$true] %s237_s27  ;;  %s240_s25 = int_to_ptr.vmem [resolvable:$true] %s239_s25 }
  0x2b   : > { %754 = dma.hbm_to_vmem [thread:$0]  (!%p1114_p0), %s238_s27, 128, %s240_s25, %s202_s19  }
  0x2c   : > { %248 = sbr.rel (%p1126_p3) target bundleno = 115 (0x73), region = 32  ;;  %s1146_s1 = sand.u32 (!%p1126_p3), 1, %s996_s13  }
  0x2d   : > { %s694_s20 = sshll.u32 (!%p1126_p3), %s1146_s1, 5  ;;  %s251_s28 = scalar_lea.sflag (!%p1126_p3), [#allocation3], %s1146_s1 }
  0x2e   : > { %s254_s14 = scalar_lea.vmem (!%p1126_p3), [#allocation2], %s694_s20 }
  0x31   : > { %979 = dma.done.wait (%p1090_p8), %s251_s28, 512  }
  0x32   : > { %981 = vsyncadd (%p1090_p8), %s251_s28, 4294966784  ;;  %s260_s12 = sand.u32 1, %s1070_s18   ;;  %s264_s25 = scalar_lea.vmem [#allocation5], %s694_s20 }
  0x33   : > { %s261_s17 = scalar_lea.sflag [#allocation6], %s260_s12 }
  0x34   : > { %983 = dma.done.wait (%p1090_p8), %s261_s17, 640  }
  0x35   : > { %985 = vsyncadd (%p1090_p8), %s261_s17, 4294966656  ;;  %v335_v0 = vlaneseq  ;;  %s696_s26 = sshll.u32 %s1146_s1, 3  ;;  %v330_v5 = vld [vmem:[%s254_s14] sm:$0xff]  ;;  %v331_v6 = vld [vmem:[%s254_s14 + $0x8] sm:$0xff]  ;;  %s735_s24 = smul.u32 120, %s1146_s1  ;;  %v1016_v44 = vmov 0.0  }
  0x36   : > { %v332_v7 = vld [vmem:[%s254_s14 + $0x10] sm:$0xff]  ;;  %v333_v8 = vld [vmem:[%s254_s14 + $0x18] sm:$0xff]  ;;  %v480_v9 = vld [vmem:[%s264_s25] sm:$0xff]  ;;  %s274_s18 = scalar_lea.vmem [#allocation7], %s696_s26  ;;  %s736_s29 = smul.u32 120, %s1004_s15 }
  0x37   : > { %v336_v1 = vshrl.u32 %v335_v0, 7  ;;  %v338_v2 = vand.u32 127, %v335_v0  ;;  %v481_v14 = vld [vmem:[%s264_s25 + $0x8] sm:$0xff]  ;;  %v482_v15 = vld [vmem:[%s264_s25 + $0x10] sm:$0xff]  ;;  %v483_v18 = vld [vmem:[%s264_s25 + $0x18] sm:$0xff]  ;;  %s1242_s27 = scalar_lea.vmem [#allocation8], %s735_s24 }
  0x38   : > { %v334_v21 = vld [vmem:[%s274_s18] sm:$0xff]  ;;  %s539_s4 = scalar_lea.hbm %s1333_s3, %s736_s29  ;;  %s540_s21 = sshll.u32 %s1242_s27, 4  ;;  %s541_s21 = int_to_ptr.vmem [resolvable:$true] %s540_s21 }
  0x39   : > { %v339_v3 = vmul.u32 128, %v336_v1  ;;  %vm378_vm1 = vcmp.eq.s32.totalorder %v334_v21, 0  ;;  %vm379_vm2 = vcmp.eq.s32.totalorder %v334_v21, 1  ;;  %vm380_vm3 = vcmp.eq.s32.totalorder %v334_v21, 2  ;;  %s542_s22 = sshll.u32 %s539_s4, 4  ;;  %s526_s23 = scalar_lea.sflag [#allocation4], %s1146_s1  ;;  %s543_s22 = int_to_ptr.hbm [resolvable:$true] %s542_s22 }
  0x3a   : > { %vm381_vm4 = vcmp.eq.s32.totalorder %v334_v21, 3  ;;  %s940_s6 = sshra.s32 %s543_s22, 4  ;;  %s946_s5 = scalar_lea.hbm %s1333_s3, 240  ;;  %s941_s6 = int_to_ptr.hbm [resolvable:$true] %s940_s6 }
  0x3b   : > { %v1160_v4 = vadd.s32 %v339_v3, %v338_v2  ;;  %s942_s7 = scalar_lea.hbm %s941_s6, 120  ;;  %p947_p7 = scmp.lt.s32.totalorder %s941_s6, %s1333_s3 }
  0x3c   : > { %p943_p4 = scmp.ne.s32.totalorder %s941_s6, %s942_s7  ;;  %p948_p8 = scmp.lt.s32.totalorder %s946_s5, %s942_s7 }
  0x3d   : > { %vm341_vm0 = vcmp.lt.s32.totalorder %v1160_v4, 256 }
  0x3e   : > { %v1165_v10 = vsel %vm341_vm0, %v330_v5, 0.0  ;;  %v1169_v11 = vsel %vm341_vm0, %v331_v6, 0.0  ;;  %v1173_v12 = vsel %vm341_vm0, %v332_v7, 0.0  ;;  %v1177_v13 = vsel %vm341_vm0, %v333_v8, 0.0  ;;  %vm382_vm5 = vmand %vm378_vm1, %vm341_vm0  ;;  %p944_p5 = pnand %p943_p4, %p1094_p9  ;;  %p949_p10 = por %p948_p8, %p947_p7 }
  0x3f   : > { %v348_v16 = vmax.f32 %v1165_v10, %v1169_v11  ;;  %v349_v17 = vmax.f32 %v1173_v12, %v1177_v13  ;;  %v1185_v19 = vsel %vm341_vm0, %v480_v9, 0.0  ;;  %v1189_v20 = vsel %vm341_vm0, %v481_v14, 0.0  ;;  %vm383_vm6 = vmand %vm379_vm2, %vm341_vm0 }
  0x40   : > { %v1195_v23 = vsel %vm341_vm0, %v482_v15, 0.0  ;;  %v1199_v24 = vsel %vm341_vm0, %v483_v18, 0.0  ;;  %v488_v25 = vmax.f32 %v1185_v19, %v1189_v20  ;;  %vm384_vm7 = vmand %vm380_vm3, %vm341_vm0  ;;  %v1234_v45 = vsel %vm382_vm5, 1.0, %v1016_v44  ;;  %p945_p6 = pneg %p944_p5 }
  0x41   : > { %v1191_v22 = vmax.f32 %v348_v16, %v349_v17  ;;  %v489_v26 = vmax.f32 %v1195_v23, %v1199_v24  ;;  %vm385_vm8 = vmand %vm381_vm4, %vm341_vm0  ;;  %v1236_v46 = vsel %vm383_vm6, 1.0, %v1016_v44  ;;  %v1238_v47 = vsel %vm384_vm7, 1.0, %v1016_v44  ;;  %724 = vst [vmem:[%s1242_s27 + $0x58] sm:$0xff] %v1234_v45 }
  0x42   : > { %v1240_v49 = vsel %vm385_vm8, 1.0, %v1016_v44  ;;  %725 = vst [vmem:[%s1242_s27 + $0x60] sm:$0xff] %v1236_v46  ;;  %v711_v0 = vsel %vm341_vm0, 1.0, %v1016_v44  ;;  %p950_p13 = pnand %p949_p10, %p945_p6 }
  0x43   : > { %v351_v27 = vsub.f32 %v1165_v10, %v1191_v22  ;;  %v352_v28 = vsub.f32 %v1169_v11, %v1191_v22  ;;  %v353_v29 = vsub.f32 %v1173_v12, %v1191_v22  ;;  %v354_v30 = vsub.f32 %v1177_v13, %v1191_v22  ;;  %726 = vst [vmem:[%s1242_s27 + $0x68] sm:$0xff] %v1238_v47 }
  0x44   : > { %v1213_v31 = vmax.f32 %v488_v25, %v489_v26  ;;  %727 = vst [vmem:[%s1242_s27 + $0x70] sm:$0xff] %v1240_v49 }
  0x45   : > { %v355_v32 = vmul.f32 1.442695, %v351_v27  ;;  %v357_v33 = vmul.f32 1.442695, %v352_v28  ;;  %v359_v34 = vmul.f32 1.442695, %v353_v29 }
  0x46   : > { %v361_v35 = vmul.f32 1.442695, %v354_v30  ;;  %v491_v36 = vsub.f32 %v1185_v19, %v1213_v31  ;;  %v492_v37 = vsub.f32 %v1189_v20, %v1213_v31  ;;  %v493_v38 = vsub.f32 %v1195_v23, %v1213_v31 }
  0x47   : > { %814 = vpow2.f32 %v355_v32  ;;  %v494_v39 = vsub.f32 %v1199_v24, %v1213_v31 }
  0x48   : > { %816 = vpow2.f32 %v357_v33  ;;  %v495_v40 = vmul.f32 1.442695, %v491_v36  ;;  %v497_v41 = vmul.f32 1.442695, %v492_v37  ;;  %v499_v42 = vmul.f32 1.442695, %v493_v38 }
  0x49   : > { %818 = vpow2.f32 %v359_v34  ;;  %v501_v43 = vmul.f32 1.442695, %v494_v39 }
  0x4a   : > { %820 = vpow2.f32 %v361_v35 }
  0x4b   : > { %822 = vpow2.f32 %v495_v40 }
  0x4c   : > { %824 = vpow2.f32 %v497_v41 }
  0x4d   : > { %v815_v48 = vpop.eup %814  ;;  %826 = vpow2.f32 %v499_v42 }
  0x4e   : > { %v817_v50 = vpop.eup %816  ;;  %828 = vpow2.f32 %v501_v43 }
  0x4f   : > { %v819_v51 = vpop.eup %818  ;;  %v363_v52 = vadd.f32 %v817_v50, %v815_v48 }
  0x50   : > { %v821_v53 = vpop.eup %820 }
  0x51   : > { %v823_v54 = vpop.eup %822  ;;  %v364_v55 = vadd.f32 %v819_v51, %v363_v52 }
  0x52   : > { %v825_v56 = vpop.eup %824 }
  0x53   : > { %v365_v57 = vadd.f32 %v821_v53, %v364_v55  ;;  %v503_v58 = vadd.f32 %v825_v56, %v823_v54  ;;  %v827_v59 = vpop.eup %826 }
  0x54   : > { %v829_v60 = vpop.eup %828 }
  0x55   : > { %830 = vrcp.f32 %v365_v57  ;;  %v504_v61 = vadd.f32 %v827_v59, %v503_v58 }
  0x56   : > { %832 = vlog2.f32 %v365_v57 }
  0x57   : > { %v505_v62 = vadd.f32 %v829_v60, %v504_v61 }
  0x59   : > { %834 = vlog2.f32 %v505_v62 }
  0x5b   : > { %v831_v63 = vpop.eup %830 }
  0x5c   : > { %v833_v1 = vpop.eup %832  ;;  %v367_v2 = vmul.f32 %v831_v63, %v815_v48  ;;  %v368_v3 = vmul.f32 %v831_v63, %v817_v50  ;;  %v369_v5 = vmul.f32 %v831_v63, %v819_v51  ;;  %v370_v6 = vmul.f32 %v831_v63, %v821_v53 }
  0x5d   : > { %v372_v7 = vmul.f32 0.6931472, %v833_v1 }
  0x5e   : > { %v401_v8 = vmul.f32 %v1234_v45, %v367_v2  ;;  %v402_v9 = vmul.f32 %v1236_v46, %v368_v3  ;;  %v403_v14 = vmul.f32 %v1238_v47, %v369_v5  ;;  %v447_v17 = vmul.f32 %v711_v0, %v367_v2 }
  0x5f   : > { %v835_v15 = vpop.eup %834  ;;  %v373_v16 = vadd.f32 %v372_v7, %v1191_v22  ;;  %v448_v18 = vmul.f32 %v711_v0, %v368_v3  ;;  %v449_v4 = vmul.f32 %v711_v0, %v369_v5  ;;  %v404_v21 = vmul.f32 %v1240_v49, %v370_v6 }
  0x60   : > { %v405_v25 = vadd.f32 %v402_v9, %v401_v8  ;;  %v450_v26 = vmul.f32 %v711_v0, %v370_v6  ;;  %v507_v27 = vmul.f32 0.6931472, %v835_v15  ;;  %716 = vst [vmem:[%s1242_s27 + $0x38] sm:$0xff] %v447_v17 }
  0x61   : > { %v374_v28 = vsub.f32 %v373_v16, %v1165_v10  ;;  %v375_v29 = vsub.f32 %v373_v16, %v1169_v11  ;;  %v376_v30 = vsub.f32 %v373_v16, %v1173_v12  ;;  %v377_v32 = vsub.f32 %v373_v16, %v1177_v13  ;;  %717 = vst [vmem:[%s1242_s27 + $0x40] sm:$0xff] %v448_v18 }
  0x62   : > { %v406_v22 = vadd.f32 %v405_v25, %v403_v14  ;;  %v508_v10 = vadd.f32 %v507_v27, %v1213_v31  ;;  %718 = vst [vmem:[%s1242_s27 + $0x48] sm:$0xff] %v449_v4 }
  0x63   : > { %v394_v33 = vmul.f32 %v1234_v45, %v374_v28  ;;  %v395_v34 = vmul.f32 %v1236_v46, %v375_v29  ;;  %v396_v35 = vmul.f32 %v1238_v47, %v376_v30  ;;  %v397_v11 = vmul.f32 %v1240_v49, %v377_v32  ;;  %719 = vst [vmem:[%s1242_s27 + $0x50] sm:$0xff] %v450_v26 }
  0x64   : > { %v407_v36 = vadd.f32 %v406_v22, %v404_v21  ;;  %v509_v31 = vsub.f32 %v508_v10, %v1185_v19  ;;  %v510_v42 = vsub.f32 %v508_v10, %v1189_v20  ;;  %v511_v48 = vsub.f32 %v508_v10, %v1195_v23 }
  0x65   : > { %v398_v37 = vadd.f32 %v395_v34, %v394_v33  ;;  %v512_v50 = vsub.f32 %v508_v10, %v1199_v24 }
  0x66   : > { %v408_v12 = vsub.f32 1.0, %v407_v36  ;;  %v425_v13 = vmul.f32 %v1234_v45, %v407_v36  ;;  %v426_v38 = vmul.f32 %v1236_v46, %v407_v36  ;;  %v427_v39 = vmul.f32 %v1238_v47, %v407_v36 }
  0x67   : > { %v399_v40 = vadd.f32 %v398_v37, %v396_v35  ;;  %v428_v41 = vmul.f32 %v1240_v49, %v407_v36  ;;  %v515_v51 = vmul.f32 %v1234_v45, %v509_v31  ;;  %v516_v52 = vmul.f32 %v1236_v46, %v510_v42 }
  0x68   : > { %v409_v43 = vmul.f32 %v408_v12, %v408_v12  ;;  %707 = vst [vmem:[%s1242_s27 + $0x18] sm:$0xff] %v425_v13  ;;  %v517_v19 = vmul.f32 %v1238_v47, %v511_v48  ;;  %v518_v20 = vmul.f32 %v1240_v49, %v512_v50 }
  0x69   : > { %v400_v44 = vadd.f32 %v399_v40, %v397_v11  ;;  %708 = vst [vmem:[%s1242_s27 + $0x20] sm:$0xff] %v426_v38  ;;  %v519_v54 = vadd.f32 %v516_v52, %v515_v51 }
  0x6a   : > { %709 = vst [vmem:[%s1242_s27 + $0x28] sm:$0xff] %v427_v39 }
  0x6b   : > { %v410_v53 = vmul.f32 %v409_v43, %v400_v44  ;;  %414 = vst [vmem:[%s1242_s27] sm:$0xff] %v400_v44  ;;  %v520_v23 = vadd.f32 %v519_v54, %v517_v19 }
  0x6c   : > { %710 = vst [vmem:[%s1242_s27 + $0x30] sm:$0xff] %v428_v41 }
  0x6d   : > { %702 = vst [vmem:[%s1242_s27 + $0x8] sm:$0xff] %v410_v53  ;;  %v521_v24 = vadd.f32 %v520_v23, %v518_v20 }
  0x6f   : > { %729 = vst [vmem:[%s1242_s27 + $0x10] sm:$0xff] %v521_v24 }
  0x70   : > { %953 = shalt.err (!%p950_p13)
}
  0x71   : > { %s1017_s1 = smov 128   ;;  %s1018_s20 = smov 8  }
  0x72   : > { %743 = dma.vmem_to_hbm [thread:$0]  (%p1094_p9), %s541_s21, 1920, %s543_s22, %s526_s23, %s1017_s1, %s1017_s1, %s1018_s20  }
  0x73 PF: > { %s1358_s28 = sld [smem:[#allocation12_spill]]  ;;  %p756_p0 = pnand %p684_p12, %p1101_p11 }
  0x74   : > { %s1360_s12 = sld [smem:[#allocation14_spill]] }
  0x75   : > { %p757_p1 = pneg %p756_p0 }
  0x79   : > { %s557_s17 = sand.u32 1, %s1358_s28  }
  0x7a   : > { %s558_s25 = scalar_lea.sflag [#allocation4], %s557_s17 }
  0x7b   : > { %987 = dma.done.wait (%p757_p1), %s558_s25, 1920  }
  0x7c   : > { %989 = vsyncadd (%p757_p1), %s558_s25, 4294965376  ;;  %s22_s17 = sadd.s32 1, %s1360_s12   ;;  %s1361_s26 = sld [smem:[#allocation13_spill]] }
  0x7d   : > { %p19_p2 = scmp.ge.s32.totalorder %s22_s17, 4   ;;  %s1362_s14 = sld [smem:[#allocation17_spill]] }
  0x7e   : > { %s1363_s18 = sld [smem:[#allocation15_spill]]  ;;  %s1364_s12 = smov %s996_s13 }
  0x7f   : > { %s1366_s15 = smov %s1008_s16 }
  0x80   :  { %21 = sbr.rel (!%p19_p2) target bundleno = 10 (0xa), region = 110 }
  0x82   : > { %s1365_s13 = smov %s1361_s26 }
  0x84   : > { %s1367_s16 = smov %s1363_s18 }
  0x85   :  { %564 = vsyncpa [#allocation3], 1 }
  0x86   :  { %566 = vsyncpa [#allocation3 + $0x1], 1 }
  0x87   :  { %567 = vsyncpa [#allocation6], 1 }
  0x88   :  { %569 = vsyncpa [#allocation6 + $0x1], 1 }
  0x89   :  { %570 = vsyncpa [#allocation4], 1 }
  0x8a   :  { %572 = vsyncpa [#allocation4 + $0x1], 1 }

</bundles_post_ra>
